<compile_context>
chip_gen: v7x
topology: tpu7x:2x2x1
jax: 0.10.0
libtpu: 0.0.40
codegen_flags: <defaults>
</compile_context>

<pallas_src>
import jax
import jax.numpy as jnp
from jax.experimental import pallas as pl
from jax.experimental.pallas import tpu as pltpu


_VPU_CHANNEL_THRESHOLD = 8            # at/below this, bypass the MXU entirely
_VPU_LANE_CHUNK = 1024                # lane chunk that keeps the VPU acc in vregs
_TARGET_TILE_BYTES = 4 * 1024 * 1024  # VMEM-resident bytes per block (padded)
_VMEM_LIMIT_BYTES = 48 * 1024 * 1024  # <= v7x's 64 MiB physical; ample on v5e/v6e
_MIN_GRID_STEPS = 4                   # keep both v7x TensorCores fed ...
_MIN_SPLIT_BYTES = 512 * 1024         # ... but never split below this payload
_STATIC_UNROLL = 8                    # static-unroll small in-kernel loops


# ---------------------------------------------------------------------------
# Kernels
# ---------------------------------------------------------------------------

def _mix_columns_vpu(mt, x_ref, o_ref, bi, start, width):
    """out[bi, :, start:start+width] = mt @ x[bi, :, start:start+width] (VPU).

    The full k-accumulation happens per lane chunk so `acc` (at most
    8 sublanes x 1024 lanes of f32 = 8 vregs) stays register-resident.
    """
    xs = x_ref[bi, :, pl.ds(start, width)]           # (C, width)
    c = xs.shape[0]
    acc = mt[:, 0:1] * xs[0:1, :]                    # (C,1)*(1,width) -> (C,width)
    for k in range(1, c):                            # C <= 8: tiny static unroll
        acc = acc + mt[:, k:k + 1] * xs[k:k + 1, :]
    o_ref[bi, :, pl.ds(start, width)] = acc.astype(o_ref.dtype)


def _mix_kernel_vpu(mt_ref, x_ref, o_ref):
    """Channel mix for small C (<= 8): chunked VPU broadcast-FMAs, no MXU.

    mt_ref: (C, C) VMEM, mt = M^T (constant block -> resident across the grid)
    x_ref : (TB, C, TILE_S) VMEM block
    o_ref : (TB, C, TILE_S) VMEM block
    """
    mt = mt_ref[...]
    tb, _, s = x_ref.shape

    chunk = min(s, _VPU_LANE_CHUNK)
    n_full = s // chunk
    rem = s - n_full * chunk

    def mix_batch(bi):
        if n_full <= _STATIC_UNROLL:                  # static chunk starts
            for ci in range(n_full):
                _mix_columns_vpu(mt, x_ref, o_ref, bi, ci * chunk, chunk)
        else:                                         # dynamic, 128-aligned starts
            @pl.loop(0, n_full)
            def _(ci):
                _mix_columns_vpu(mt, x_ref, o_ref, bi,
                                 pl.multiple_of(ci * chunk, chunk), chunk)
        if rem:                                       # static (possibly masked) tail
            _mix_columns_vpu(mt, x_ref, o_ref, bi, n_full * chunk, rem)

    if tb <= _STATIC_UNROLL:
        for bi in range(tb):
            mix_batch(bi)
    else:
        @pl.loop(0, tb)
        def _(bi):
            mix_batch(bi)


def _mix_kernel_mxu(mt_ref, x_ref, o_ref):
    """Channel mix for C > 8 on the MXU: out[b] = M^T @ x[b] (f32-faithful)."""
    mt = mt_ref[...]
    tb = x_ref.shape[0]

    def mix_batch(bi):
        o_ref[bi] = jnp.dot(
            mt, x_ref[bi],
            preferred_element_type=jnp.float32,
            precision=jax.lax.Precision.HIGHEST,
        ).astype(o_ref.dtype)

    if tb <= _STATIC_UNROLL:
        for bi in range(tb):
            mix_batch(bi)
    else:
        @pl.loop(0, tb)
        def _(bi):
            mix_batch(bi)


# ---------------------------------------------------------------------------
# Block / grid planning
# ---------------------------------------------------------------------------

def _pick_spatial_tile(hw, target_cols):
    """Largest multiple of 128 <= target_cols dividing hw (no masked tail step).

    Falls back to target_cols (cdiv grid with a masked tail) if no divisor.
    """
    t = (target_cols // 128) * 128
    while t >= 128:
        if hw % t == 0:
            return t
        t -= 128
    return (target_cols // 128) * 128


def _plan_blocks(b, c, hw, itemsize):
    """Choose (tb, tile_s) block shape and (n_b, n_s) grid extents."""
    c_pad = ((c + 7) // 8) * 8                         # sublane padding in VMEM

    def block_bytes(tb_, ts_):
        ts_pad = ((ts_ + 127) // 128) * 128            # lane padding in VMEM
        return tb_ * c_pad * ts_pad * itemsize

    target_cols = max(128, (_TARGET_TILE_BYTES // (itemsize * c_pad)) // 128 * 128)

    if hw > target_cols:
        tile_s, tb = _pick_spatial_tile(hw, target_cols), 1
    else:
        # Small image: whole spatial extent fits in one block -> aggregate over
        # batch (contiguous in HBM) to amortize per-grid-step overhead.
        tile_s, tb = hw, max(1, min(b, target_cols // max(hw, 1)))

    n_b, n_s = pl.cdiv(b, tb), pl.cdiv(hw, tile_s)

    # v7x has two TensorCores: a ("parallel", "parallel") grid only helps if
    # there are >= 2 steps to shard.  Split further only while the per-step
    # payload still dominates the ~0.35us/step fixed overhead.
    while (n_b * n_s < _MIN_GRID_STEPS
           and block_bytes(tb, tile_s) >= 2 * _MIN_SPLIT_BYTES):
        if tb > 1:
            tb = (tb + 1) // 2                         # undo batch aggregation first
        else:
            new_s = max(128, ((tile_s // 2 + 127) // 128) * 128)
            if new_s >= tile_s:
                break
            tile_s = new_s
        n_b, n_s = pl.cdiv(b, tb), pl.cdiv(hw, tile_s)

    return tb, tile_s, n_b, n_s


# ---------------------------------------------------------------------------
# Public forward
# ---------------------------------------------------------------------------

def invertible_1x1_conv_forward(x, matrix):
    """Forward of Invertible1to1Conv.

    Args:
      x:      (B, C, H, W) float32, NCHW (PyTorch convention).
      matrix: (C, C) float32.
    Returns:
      (out, log_det) with out: (B, C, H, W), log_det: (B,)
    """
    b, c, h, w = x.shape
    hw = h * w

    # NCHW -> (B, C, H*W): contiguous reshape, no transpose / extra HBM traffic.
    x3 = x.reshape(b, c, hw)
    mt = matrix.T                 # mt[j, k] = M[k, j]  =>  out[b] = mt @ x[b]

    tb, tile_s, n_b, n_s = _plan_blocks(b, c, hw, jnp.dtype(x.dtype).itemsize)
    kernel = _mix_kernel_vpu if c <= _VPU_CHANNEL_THRESHOLD else _mix_kernel_mxu

    # NOTE: padded tail blocks (batch and/or spatial) are safe because every
    # output column depends only on its matching input column/batch element.
    # The padded input region holds unspecified values -- do NOT add reductions
    # across the batch or lane axes inside the kernel without masking them.
    out3 = pl.pallas_call(
        kernel,
        out_shape=jax.ShapeDtypeStruct((b, c, hw), x.dtype),
        grid_spec=pltpu.PrefetchScalarGridSpec(
            num_scalar_prefetch=0,
            grid=(n_b, n_s),
            in_specs=[
                pl.BlockSpec((c, c), lambda bi, si: (0, 0)),               # M^T
                pl.BlockSpec((tb, c, tile_s), lambda bi, si: (bi, 0, si)),
            ],
            out_specs=pl.BlockSpec((tb, c, tile_s), lambda bi, si: (bi, 0, si)),
        ),
        compiler_params=pltpu.CompilerParams(
            dimension_semantics=("parallel", "parallel"),
            vmem_limit_bytes=_VMEM_LIMIT_BYTES,
        ),
    )(mt, x3)

    out = out3.reshape(b, c, h, w)

    # TODO(synk): log|det| of the tiny (C, C) matrix (LU/slogdet) has no clean
    # Pallas path; compute it with plain JAX and broadcast over batch.
    _, logabsdet = jnp.linalg.slogdet(matrix)
    log_det = jnp.broadcast_to((h * w) * logabsdet, (b,)).astype(x.dtype)

    return out, log_det


# ---------------------------------------------------------------------------
# Reference + tests
# ---------------------------------------------------------------------------

def make_init_matrix(n_channel, key):
    """Identity with permuted columns, matching the PyTorch module init."""
    eye = jnp.eye(n_channel, dtype=jnp.float32)
    perm = jax.random.permutation(key, n_channel)
    return eye[:, perm]


def _reference(x, matrix):
    """Pure-JAX reference mirroring the PyTorch forward."""
    out = jnp.einsum(
        "bchw,cj->bjhw", x, matrix, precision=jax.lax.Precision.HIGHEST
    )
    b, _, h, w = x.shape
    _, logabsdet = jnp.linalg.slogdet(matrix)
    log_det = jnp.broadcast_to((h * w) * logabsdet, (b,)).astype(x.dtype)
    return out, log_det


def _check(x, matrix, atol, rtol):
    out, log_det = invertible_1x1_conv_forward(x, matrix)
    out = jax.block_until_ready(out)
    log_det = jax.block_until_ready(log_det)
    ref_out, ref_logdet = _reference(x, matrix)
    assert out.shape == x.shape
    assert log_det.shape == (x.shape[0],)
    assert jnp.allclose(out, ref_out, atol=atol, rtol=rtol), (
        float(jnp.max(jnp.abs(out - ref_out))))
    assert jnp.allclose(log_det, ref_logdet, atol=1e-4, rtol=1e-4)


if __name__ == "__main__":
    key = jax.random.PRNGKey(0)
    k1, k2, k3, k4, k5, k6 = jax.random.split(key, 6)

    # --- module demo config: small C / VPU path, one batch-aggregated block ---
    B, C, H, W = 2, 4, 16, 16
    x = jax.random.normal(k1, (B, C, H, W), dtype=jnp.float32)
    matrix = make_init_matrix(C, k2)
    _check(x, matrix, atol=1e-5, rtol=1e-5)

    # --- larger C / MXU path (precision=HIGHEST keeps this ~f32-exact) ---
    B2, C2, H2, W2 = 2, 128, 16, 16
    x2 = jax.random.normal(k3, (B2, C2, H2, W2), dtype=jnp.float32)
    m2 = jax.random.normal(k4, (C2, C2), dtype=jnp.float32) / jnp.sqrt(C2)
    _check(x2, m2, atol=2e-3, rtol=2e-3)

    # --- VPU path with a multi-chunk spatial slab plus a non-1024 tail ---
    B3, C3, H3, W3 = 3, 4, 48, 48            # hw = 2304 = 2*1024 + 256
    x3 = jax.random.normal(k5, (B3, C3, H3, W3), dtype=jnp.float32)
    m3 = jax.random.normal(k6, (C3, C3), dtype=jnp.float32)
    _check(x3, m3, atol=1e-4, rtol=1e-4)

    print("KERNEL_OK")
</pallas_src>

<mosaic_0001>
module attributes {stable_mosaic.version = 11 : i64} {
  func.func @_mix_kernel_vpu(%arg0: i32, %arg1: i32, %arg2: memref<4x4xf32, #tpu.memory_space<vmem>>, %arg3: memref<2x4x256xf32, #tpu.memory_space<vmem>>, %arg4: memref<2x4x256xf32, #tpu.memory_space<vmem>>) attributes {dimension_semantics = [#tpu.dimension_semantics<parallel>, #tpu.dimension_semantics<parallel>], iteration_bounds = array<i64: 1, 1>, scalar_prefetch = 0 : i64, scratch_operands = 0 : i64, tpu.core_type = #tpu.core_type<tc>, window_params = [{pipeline_mode = #tpu.pipeline_mode<synchronous>, transform_indices = @transform_0, window_bounds = array<i64: 4, 4>}, {transform_indices = @transform_1, window_bounds = array<i64: 2, 4, 256>}, {transform_indices = @transform_2, window_bounds = array<i64: 2, 4, 256>}]} {
    %c0 = arith.constant 0 : index
    %c0_0 = arith.constant 0 : index
    %0 = vector.load %arg2[%c0, %c0_0] : memref<4x4xf32, #tpu.memory_space<vmem>>, vector<4x4xf32>
    %c0_1 = arith.constant 0 : index
    %c0_2 = arith.constant 0 : index
    %c0_3 = arith.constant 0 : index
    %1 = vector.load %arg3[%c0_1, %c0_2, %c0_3] : memref<2x4x256xf32, #tpu.memory_space<vmem>>, vector<1x4x256xf32>
    %2 = vector.shape_cast %1 : vector<1x4x256xf32> to vector<4x256xf32>
    %3 = vector.extract_strided_slice %0 {offsets = [0, 0], sizes = [4, 1], strides = [1, 1]} : vector<4x4xf32> to vector<4x1xf32>
    %4 = vector.extract_strided_slice %2 {offsets = [0, 0], sizes = [1, 256], strides = [1, 1]} : vector<4x256xf32> to vector<1x256xf32>
    %5 = vector.broadcast %3 : vector<4x1xf32> to vector<4x256xf32>
    %6 = vector.broadcast %4 : vector<1x256xf32> to vector<4x256xf32>
    %7 = arith.mulf %5, %6 : vector<4x256xf32>
    %8 = vector.extract_strided_slice %0 {offsets = [0, 1], sizes = [4, 1], strides = [1, 1]} : vector<4x4xf32> to vector<4x1xf32>
    %9 = vector.extract_strided_slice %2 {offsets = [1, 0], sizes = [1, 256], strides = [1, 1]} : vector<4x256xf32> to vector<1x256xf32>
    %10 = vector.broadcast %8 : vector<4x1xf32> to vector<4x256xf32>
    %11 = vector.broadcast %9 : vector<1x256xf32> to vector<4x256xf32>
    %12 = arith.mulf %10, %11 : vector<4x256xf32>
    %13 = arith.addf %7, %12 : vector<4x256xf32>
    %14 = vector.extract_strided_slice %0 {offsets = [0, 2], sizes = [4, 1], strides = [1, 1]} : vector<4x4xf32> to vector<4x1xf32>
    %15 = vector.extract_strided_slice %2 {offsets = [2, 0], sizes = [1, 256], strides = [1, 1]} : vector<4x256xf32> to vector<1x256xf32>
    %16 = vector.broadcast %14 : vector<4x1xf32> to vector<4x256xf32>
    %17 = vector.broadcast %15 : vector<1x256xf32> to vector<4x256xf32>
    %18 = arith.mulf %16, %17 : vector<4x256xf32>
    %19 = arith.addf %13, %18 : vector<4x256xf32>
    %20 = vector.extract_strided_slice %0 {offsets = [0, 3], sizes = [4, 1], strides = [1, 1]} : vector<4x4xf32> to vector<4x1xf32>
    %21 = vector.extract_strided_slice %2 {offsets = [3, 0], sizes = [1, 256], strides = [1, 1]} : vector<4x256xf32> to vector<1x256xf32>
    %22 = vector.broadcast %20 : vector<4x1xf32> to vector<4x256xf32>
    %23 = vector.broadcast %21 : vector<1x256xf32> to vector<4x256xf32>
    %24 = arith.mulf %22, %23 : vector<4x256xf32>
    %25 = arith.addf %19, %24 : vector<4x256xf32>
    %c0_4 = arith.constant 0 : index
    %c0_5 = arith.constant 0 : index
    %c0_6 = arith.constant 0 : index
    %26 = vector.load %arg4[%c0_4, %c0_5, %c0_6] : memref<2x4x256xf32, #tpu.memory_space<vmem>>, vector<1x4x256xf32>
    %27 = vector.shape_cast %26 : vector<1x4x256xf32> to vector<4x256xf32>
    %28 = vector.shape_cast %25 : vector<4x256xf32> to vector<1x4x256xf32>
    tpu.vector_store %arg4[%c0_4, %c0_5, %c0_6], %28 {strides = array<i32>} : memref<2x4x256xf32, #tpu.memory_space<vmem>>, vector<1x4x256xf32>,
    %c1 = arith.constant 1 : index
    %c0_7 = arith.constant 0 : index
    %c0_8 = arith.constant 0 : index
    %29 = vector.load %arg3[%c1, %c0_7, %c0_8] : memref<2x4x256xf32, #tpu.memory_space<vmem>>, vector<1x4x256xf32>
    %30 = vector.shape_cast %29 : vector<1x4x256xf32> to vector<4x256xf32>
    %31 = vector.extract_strided_slice %0 {offsets = [0, 0], sizes = [4, 1], strides = [1, 1]} : vector<4x4xf32> to vector<4x1xf32>
    %32 = vector.extract_strided_slice %30 {offsets = [0, 0], sizes = [1, 256], strides = [1, 1]} : vector<4x256xf32> to vector<1x256xf32>
    %33 = vector.broadcast %31 : vector<4x1xf32> to vector<4x256xf32>
    %34 = vector.broadcast %32 : vector<1x256xf32> to vector<4x256xf32>
    %35 = arith.mulf %33, %34 : vector<4x256xf32>
    %36 = vector.extract_strided_slice %0 {offsets = [0, 1], sizes = [4, 1], strides = [1, 1]} : vector<4x4xf32> to vector<4x1xf32>
    %37 = vector.extract_strided_slice %30 {offsets = [1, 0], sizes = [1, 256], strides = [1, 1]} : vector<4x256xf32> to vector<1x256xf32>
    %38 = vector.broadcast %36 : vector<4x1xf32> to vector<4x256xf32>
    %39 = vector.broadcast %37 : vector<1x256xf32> to vector<4x256xf32>
    %40 = arith.mulf %38, %39 : vector<4x256xf32>
    %41 = arith.addf %35, %40 : vector<4x256xf32>
    %42 = vector.extract_strided_slice %0 {offsets = [0, 2], sizes = [4, 1], strides = [1, 1]} : vector<4x4xf32> to vector<4x1xf32>
    %43 = vector.extract_strided_slice %30 {offsets = [2, 0], sizes = [1, 256], strides = [1, 1]} : vector<4x256xf32> to vector<1x256xf32>
    %44 = vector.broadcast %42 : vector<4x1xf32> to vector<4x256xf32>
    %45 = vector.broadcast %43 : vector<1x256xf32> to vector<4x256xf32>
    %46 = arith.mulf %44, %45 : vector<4x256xf32>
    %47 = arith.addf %41, %46 : vector<4x256xf32>
    %48 = vector.extract_strided_slice %0 {offsets = [0, 3], sizes = [4, 1], strides = [1, 1]} : vector<4x4xf32> to vector<4x1xf32>
    %49 = vector.extract_strided_slice %30 {offsets = [3, 0], sizes = [1, 256], strides = [1, 1]} : vector<4x256xf32> to vector<1x256xf32>
    %50 = vector.broadcast %48 : vector<4x1xf32> to vector<4x256xf32>
    %51 = vector.broadcast %49 : vector<1x256xf32> to vector<4x256xf32>
    %52 = arith.mulf %50, %51 : vector<4x256xf32>
    %53 = arith.addf %47, %52 : vector<4x256xf32>
    %c1_9 = arith.constant 1 : index
    %c0_10 = arith.constant 0 : index
    %c0_11 = arith.constant 0 : index
    %54 = vector.load %arg4[%c1_9, %c0_10, %c0_11] : memref<2x4x256xf32, #tpu.memory_space<vmem>>, vector<1x4x256xf32>
    %55 = vector.shape_cast %54 : vector<1x4x256xf32> to vector<4x256xf32>
    %56 = vector.shape_cast %53 : vector<4x256xf32> to vector<1x4x256xf32>
    tpu.vector_store %arg4[%c1_9, %c0_10, %c0_11], %56 {strides = array<i32>} : memref<2x4x256xf32, #tpu.memory_space<vmem>>, vector<1x4x256xf32>,
    return
  }
  func.func @transform_0(%arg0: i32, %arg1: i32) -> (i32, i32) {
    %c0_i32 = arith.constant 0 : i32
    %c0_i32_0 = arith.constant 0 : i32
    %c0_i32_1 = arith.constant 0 : i32
    return %c0_i32, %c0_i32_0 : i32, i32
  }
  func.func @transform_1(%arg0: i32, %arg1: i32) -> (i32, i32, i32) {
    %c0_i32 = arith.constant 0 : i32
    %c0_i32_0 = arith.constant 0 : i32
    return %arg0, %c0_i32, %arg1 : i32, i32, i32
  }
  func.func @transform_2(%arg0: i32, %arg1: i32) -> (i32, i32, i32) {
    %c0_i32 = arith.constant 0 : i32
    %c0_i32_0 = arith.constant 0 : i32
    return %arg0, %c0_i32, %arg1 : i32, i32, i32
  }
}

</mosaic_0001>

<bundles_post_ra>
// kernel: tpu_custom_call.1
= control target key start
LH: loop header
LB: loop body
LE: loop exit
PB: predicated region body
PF: predicated region fallthrough
CT: control target
= control target key end

     0   :  { %7 = vsyncpa [#allocation3], 0  ;;  %s421_s0 = inlined_call_operand.hbm [shape: f32[4,4], index: 0, kind: input, shape index: {}]   ;;  %s422_s1 = inlined_call_operand.hbm [shape: f32[2,4,256], index: 1, kind: input, shape index: {}]   ;;  %s423_s2 = inlined_call_operand.hbm [shape: f32[2,4,256], index: 2, kind: output, shape index: {}]  }
   0x1   :  { %8 = vsyncpa [#allocation6], 0 }
   0x2   :  { %9 = vsyncpa [#allocation4], 0  ;;  %s348_s9 = smov [#allocation2]   ;;  %s349_s11 = smov [#allocation5]  }
   0x3   :  { %s16_s10 = sshll.u32 %s348_s9, 4  ;;  %s25_s12 = sshll.u32 %s349_s11, 4  ;;  %s17_s10 = int_to_ptr.vmem [resolvable:$true] %s16_s10  ;;  %s372_s12 = int_to_ptr.vmem [resolvable:$true] %s25_s12 }
   0x4   :  { %s276_s15 = scalar_lea.hbm %s421_s0, 64 }
   0x5   :  { %p277_p0 = scmp.ne.s32.totalorder %s421_s0, %s276_s15  ;;  %p280_p1 = scmp.lt.u32.totalorder %s276_s15, %s421_s0 }
   0x7   :  { %p282_p2 = pnand %p280_p1, %p277_p0 }
   0x9   :  { %285 = shalt.err (!%p282_p2)
}
   0xa   :  { %s286_s20 = scalar_lea.vmem %s17_s10, 64  ;;  %p291_p4 = scmp.lt.s32.totalorder %s17_s10, %s17_s10 }
   0xb   :  { %p287_p3 = scmp.ne.s32.totalorder %s17_s10, %s286_s20  ;;  %p292_p5 = scmp.lt.s32.totalorder %s286_s20, %s286_s20 }
   0xd   :  { %p293_p6 = por %p292_p5, %p291_p4 }
   0xf   :  { %p294_p7 = pnand %p293_p6, %p287_p3 }
  0x11   :  { %297 = shalt.err (!%p294_p7)
}
  0x12   :  { %19 = dma.hbm_to_vmem [thread:$0]  %s421_s0, 64, %s17_s10, [#allocation3]  }
  0x13   :  { %s298_s25 = scalar_lea.hbm %s422_s1, 256 }
  0x14   :  { %p299_p8 = scmp.ne.s32.totalorder %s422_s1, %s298_s25  ;;  %p302_p9 = scmp.lt.u32.totalorder %s298_s25, %s422_s1 }
  0x16   :  { %p304_p10 = pnand %p302_p9, %p299_p8 }
  0x18   :  { %307 = shalt.err (!%p304_p10)
}
  0x19   :  { %s308_s30 = scalar_lea.vmem %s372_s12, 256  ;;  %p313_p12 = scmp.lt.s32.totalorder %s372_s12, %s372_s12 }
  0x1a   :  { %p309_p11 = scmp.ne.s32.totalorder %s372_s12, %s308_s30  ;;  %p314_p13 = scmp.lt.s32.totalorder %s308_s30, %s308_s30 }
  0x1c   :  { %p315_p0 = por %p314_p13, %p313_p12 }
  0x1e   :  { %p316_p1 = pnand %p315_p0, %p309_p11 }
  0x20   :  { %319 = shalt.err (!%p316_p1)
}
  0x21   :  { %s350_s0 = smov 128   ;;  %s351_s3 = smov 8  }
  0x22   :  { %31 = dma.hbm_to_vmem [thread:$0]  %s422_s1, 256, %s372_s12, [#allocation6], %s350_s0, %s350_s0, %s351_s3  }
  0x23   :  { %342 = dma.done.wait [#allocation3], 64  }
  0x24   :  { %343 = vsyncadd [#allocation3], 4294967232 }
  0x25   :  { %344 = dma.done.wait [#allocation6], 256  }
  0x26   :  { %345 = vsyncadd [#allocation6], 4294967040  ;;  %v352_v0 = vmov 0   ;;  %v353_v1 = vmov 2   ;;  %v38_v2 = vld [vmem:[#allocation2] sm:$0xf]  ;;  %v46_v5 = vlaneseq }
  0x27   :  { %271 = vset.pattern.permute.xlu0 %v352_v0  ;;  %273 = vset.pattern.permute.xlu1 %v353_v1  ;;  %v354_v3 = vmov 1   ;;  %v355_v4 = vmov 3   ;;  %v39_v9 = vld [vmem:[#allocation5] sm:$0xff]  ;;  %v150_v10 = vld [vmem:[#allocation5 + $0x8] sm:$0xff]  ;;  %s356_s1 = smov [#allocation7]  }
  0x28   :  { %42 = vperm.xlu0 %271, %v38_v2   ;;  %93 = vperm.xlu1 %273, %v38_v2   ;;  %v47_v6 = vshrl.u32 %v46_v5, 7  ;;  %s249_s6 = sshll.u32 %s356_s1, 4  ;;  %s250_s6 = int_to_ptr.vmem [resolvable:$true] %s249_s6 }
  0x29   :  { %s320_s7 = scalar_lea.vmem %s250_s6, 256  ;;  %p325_p3 = scmp.lt.s32.totalorder %s250_s6, %s250_s6 }
  0x2a   :  { %v48_v7 = vsub.s32 0, %v47_v6  ;;  %v52_v8 = vsub.s32 4, %v47_v6  ;;  %v98_v11 = vsub.s32 2, %v47_v6  ;;  %v102_v12 = vsub.s32 6, %v47_v6  ;;  %p321_p2 = scmp.ne.s32.totalorder %s250_s6, %s320_s7  ;;  %p326_p4 = scmp.lt.s32.totalorder %s320_s7, %s320_s7 }
  0x2b   :  { %v72_v13 = vsub.s32 1, %v47_v6  ;;  %v76_v14 = vsub.s32 5, %v47_v6  ;;  %v124_v15 = vsub.s32 3, %v47_v6  ;;  %v128_v16 = vsub.s32 7, %v47_v6 }
  0x2c   :  { %272 = vset.pattern.permute.xlu0 %v354_v3  ;;  %274 = vset.pattern.permute.xlu1 %v355_v4  ;;  %v49_v17 = vrot.slane %v39_v9, %v48_v7  ;;  %v53_v18 = vrot.slane %v39_v9, %v52_v8  ;;  %v155_v19 = vrot.slane %v150_v10, %v48_v7  ;;  %p327_p5 = por %p326_p4, %p325_p3 }
  0x2d   :  { %67 = vperm.xlu0 %272, %v38_v2   ;;  %119 = vperm.xlu1 %274, %v38_v2   ;;  %v159_v20 = vrot.slane %v150_v10, %v52_v8  ;;  %v99_v21 = vrot.slane %v39_v9, %v98_v11  ;;  %v103_v22 = vrot.slane %v39_v9, %v102_v12 }
  0x2e   :  { %v197_v23 = vrot.slane %v150_v10, %v98_v11  ;;  %v201_v24 = vrot.slane %v150_v10, %v102_v12  ;;  %v73_v25 = vrot.slane %v39_v9, %v72_v13  ;;  %v77_v26 = vrot.slane %v39_v9, %v76_v14  ;;  %p328_p6 = pnand %p327_p5, %p321_p2 }
  0x2f   :  { %v175_v27 = vrot.slane %v150_v10, %v72_v13  ;;  %v179_v28 = vrot.slane %v150_v10, %v76_v14  ;;  %v125_v29 = vrot.slane %v39_v9, %v124_v15  ;;  %v129_v30 = vrot.slane %v39_v9, %v128_v16 }
  0x30   :  { %v219_v31 = vrot.slane %v150_v10, %v124_v15  ;;  %v223_v32 = vrot.slane %v150_v10, %v128_v16  ;;  %v59_v33 = vrot.slane %v49_v17, %v48_v7  ;;  %v63_v34 = vrot.slane %v53_v18, %v48_v7 }
  0x31   :  { %275 = vset.pattern.permute.xlu0 %v355_v4  ;;  %v165_v35 = vrot.slane %v155_v19, %v48_v7  ;;  %v169_v36 = vrot.slane %v159_v20, %v48_v7  ;;  %v109_v39 = vrot.slane %v99_v21, %v98_v11  ;;  %v113_v40 = vrot.slane %v103_v22, %v98_v11 }
  0x32   :  { %v207_v41 = vrot.slane %v197_v23, %v98_v11  ;;  %v211_v42 = vrot.slane %v201_v24, %v98_v11  ;;  %v83_v43 = vrot.slane %v73_v25, %v72_v13  ;;  %v87_v44 = vrot.slane %v77_v26, %v72_v13 }
  0x33   :  { %v185_v45 = vrot.slane %v175_v27, %v72_v13  ;;  %v189_v46 = vrot.slane %v179_v28, %v72_v13  ;;  %v135_v47 = vrot.slane %v125_v29, %v124_v15  ;;  %v139_v48 = vrot.slane %v129_v30, %v124_v15 }
  0x34   :  { %v229_v49 = vrot.slane %v219_v31, %v124_v15  ;;  %v233_v50 = vrot.slane %v223_v32, %v124_v15 }
  0xa7   :  { %v43_v37 = vpop.permute.xlu0 %42  ;;  %v94_v38 = vpop.permute.xlu1 %93 }
  0xa8   :  { %v64_v51 = vmul.f32 %v59_v33, %v43_v37  ;;  %v65_v52 = vmul.f32 %v63_v34, %v43_v37  ;;  %v170_v53 = vmul.f32 %v165_v35, %v43_v37  ;;  %v171_v54 = vmul.f32 %v169_v36, %v43_v37 }
  0xa9   :  { %v114_v55 = vmul.f32 %v109_v39, %v94_v38  ;;  %v115_v56 = vmul.f32 %v113_v40, %v94_v38  ;;  %v212_v57 = vmul.f32 %v207_v41, %v94_v38  ;;  %v213_v58 = vmul.f32 %v211_v42, %v94_v38 }
  0xac   :  { %v68_v59 = vpop.permute.xlu0 %67  ;;  %v120_v60 = vpop.permute.xlu1 %119 }
  0xad   :  { %v88_v61 = vmul.f32 %v83_v43, %v68_v59  ;;  %v89_v62 = vmul.f32 %v87_v44, %v68_v59  ;;  %v190_v63 = vmul.f32 %v185_v45, %v68_v59  ;;  %v191_v0 = vmul.f32 %v189_v46, %v68_v59 }
  0xae   :  { %v140_v1 = vmul.f32 %v135_v47, %v120_v60  ;;  %v141_v2 = vmul.f32 %v139_v48, %v120_v60  ;;  %v234_v3 = vmul.f32 %v229_v49, %v120_v60  ;;  %v235_v4 = vmul.f32 %v233_v50, %v120_v60 }
  0xaf   :  { %v90_v5 = vadd.f32 %v88_v61, %v64_v51  ;;  %v91_v6 = vadd.f32 %v89_v62, %v65_v52  ;;  %v192_v7 = vadd.f32 %v190_v63, %v170_v53  ;;  %v193_v8 = vadd.f32 %v191_v0, %v171_v54 }
  0xb1   :  { %v116_v9 = vadd.f32 %v114_v55, %v90_v5  ;;  %v117_v10 = vadd.f32 %v115_v56, %v91_v6  ;;  %v214_v11 = vadd.f32 %v212_v57, %v192_v7  ;;  %v215_v12 = vadd.f32 %v213_v58, %v193_v8 }
  0xb3   :  { %v142_v13 = vadd.f32 %v140_v1, %v116_v9  ;;  %v143_v14 = vadd.f32 %v141_v2, %v117_v10  ;;  %v236_v15 = vadd.f32 %v234_v3, %v214_v11  ;;  %v237_v16 = vadd.f32 %v235_v4, %v215_v12 }
  0xb5   :  { %v146_v17 = vcombine.low %v142_v13, %v143_v14  ;;  %v240_v18 = vcombine.low %v236_v15, %v237_v16 }
  0xb7   :  { %148 = vst [vmem:[#allocation7] sm:$0xff] %v146_v17  ;;  %243 = vst [vmem:[#allocation7 + $0x8] sm:$0xff] %v240_v18 }
  0xb8   :  { %331 = shalt.err (!%p328_p6)
}
  0xb9   :  { %s332_s10 = scalar_lea.hbm %s423_s2, 256 }
  0xba   :  { %p333_p7 = scmp.ne.s32.totalorder %s423_s2, %s332_s10  ;;  %p336_p8 = scmp.lt.u32.totalorder %s332_s10, %s423_s2 }
  0xbc   :  { %p338_p9 = pnand %p336_p8, %p333_p7 }
  0xbe   :  { %341 = shalt.err (!%p338_p9)
}
  0xbf   :  { %255 = dma.vmem_to_hbm [thread:$0]  %s250_s6, 256, %s423_s2, [#allocation4], %s350_s0, %s350_s0, %s351_s3  }
  0xc0   :  { %346 = dma.done.wait [#allocation4], 256  }
  0xc1   :  { %347 = vsyncadd [#allocation4], 4294967040 }
  0xc2   :  { %259 = vsyncpa [#allocation3], 1 }
  0xc3   :  { %260 = vsyncpa [#allocation6], 1 }
  0xc4   :  { %261 = vsyncpa [#allocation4], 1 }

</bundles_post_ra>
